<compile_context>
chip_gen: v7x
topology: tpu7x:2x2x1
jax: 0.10.0
libtpu: 0.0.40
codegen_flags: <defaults>
</compile_context>

<pallas_src>
import jax
import jax.numpy as jnp
from jax.experimental import pallas as pl
from jax.experimental.pallas import tpu as pltpu

LAYER_NORM_EPS = 1e-12


def _round_up(x, m):
    return ((x + m - 1) // m) * m


def _pick_row_tile(rows):
    # Require >= 4 grid steps so on v7x (grid split across 2 TCs) each TensorCore still gets
    # >= 2 steps and the HBM<->VMEM pipeline can double-buffer.  Floor at 16 rows (bf16 packs
    # 16 sublanes per vreg; avoids sub-minimum bf16 tiles for any bf16-typed block).
    for cand in (1024, 512, 256, 128, 64, 32, 16):
        if rows >= 4 * cand:
            return cand
    return 16


def _maybe_pad2d(x, rows_pad, cols_pad):
    r, c = x.shape
    if r == rows_pad and c == cols_pad:
        return x  # no host-side copy when already aligned (the common real-BERT case)
    return jnp.pad(x, ((0, rows_pad - r), (0, cols_pad - c)))


def _ln_epilogue(x, p_ref, h_true, h_pad, eps):
    """x: (rows, H_pad) f32 pre-LN activations.  p_ref rows: [bias, gamma, beta, valid-mask]."""
    inv_h = 1.0 / float(h_true)
    if h_pad != h_true:
        valid = p_ref[3:4, :]                     # precomputed (1, H_pad) f32 mask (no per-step iota)
        x = x * valid
        mean = jnp.sum(x, axis=-1, keepdims=True) * inv_h
        centered = x - mean
        masked = centered * valid
        var = jnp.sum(masked * masked, axis=-1, keepdims=True) * inv_h
    else:
        mean = jnp.sum(x, axis=-1, keepdims=True) * inv_h
        centered = x - mean
        var = jnp.sum(centered * centered, axis=-1, keepdims=True) * inv_h
    inv = jax.lax.rsqrt(var + eps)
    return centered * inv * p_ref[1:2, :] + p_ref[2:3, :]


def _make_resident_kernel(h_true, h_pad, eps, compute_dtype):
    def kernel(h_ref, w_ref, p_ref, res_ref, o_ref):
        # In-kernel bf16 cast of the activation tile -> no extra host-side astype pass.
        x = jnp.dot(h_ref[...].astype(compute_dtype), w_ref[...],
                    preferred_element_type=jnp.float32)
        x = x + p_ref[0:1, :]                         # dense bias (f32)
        # TODO(synk): dropout omitted — module run in eval mode (identity); training would need
        # pltpu.prng_seed / prng_random_bits masking here.
        x = x + res_ref[...].astype(jnp.float32)      # residual stays f32 (matches PyTorch)
        o_ref[...] = _ln_epilogue(x, p_ref, h_true, h_pad, eps).astype(o_ref.dtype)
    return kernel


def _make_ktiled_kernel(h_true, h_pad, eps, compute_dtype):
    def kernel(h_ref, w_ref, p_ref, res_ref, o_ref, acc_ref):
        k = pl.program_id(1)

        @pl.when(k == 0)
        def _():
            acc_ref[...] = jnp.zeros_like(acc_ref)

        acc_ref[...] += jnp.dot(h_ref[...].astype(compute_dtype), w_ref[...],
                                preferred_element_type=jnp.float32)

        @pl.when(k == pl.num_programs(1) - 1)
        def _():
            x = acc_ref[...] + p_ref[0:1, :]
            x = x + res_ref[...].astype(jnp.float32)
            o_ref[...] = _ln_epilogue(x, p_ref, h_true, h_pad, eps).astype(o_ref.dtype)
    return kernel


def bert_output(hidden_states, input_tensor, weight, bias, gamma, beta, *,
                eps=LAYER_NORM_EPS, row_tile=None, matmul_dtype=jnp.bfloat16,
                out_dtype=None, max_resident_weight_bytes=8 * 1024 * 1024, k_tile=512):
    """hidden_states: [B, S, I]; input_tensor: [B, S, H]; weight: [I, H]; bias/gamma/beta: [H]."""
    B, S, I = hidden_states.shape
    H = input_tensor.shape[-1]
    rows = B * S
    out_dtype = jnp.dtype(hidden_states.dtype if out_dtype is None else out_dtype)

    I_pad = _round_up(I, 128)
    H_pad = _round_up(H, 128)

    act_bytes = jnp.dtype(hidden_states.dtype).itemsize
    res_bytes = jnp.dtype(input_tensor.dtype).itemsize
    out_bytes = out_dtype.itemsize
    w_elem_bytes = jnp.dtype(matmul_dtype).itemsize
    w_bytes_total = I_pad * H_pad * w_elem_bytes

    # VMEM budget: v7x has 64 MiB/TC, v5e/v6e have 128 MiB.
    try:
        phys_vmem = int(pltpu.get_tpu_info().vmem_capacity_bytes)
    except Exception:
        phys_vmem = 64 * 1024 * 1024
    vmem_limit = min(96 * 1024 * 1024, phys_vmem * 3 // 4)

    # Resident weight only if it fits comfortably; otherwise K-tile the reduction axis.
    resident_ok = w_bytes_total <= min(max_resident_weight_bytes, vmem_limit // 4)
    if resident_ok:
        tk = I_pad
        w_buf_bytes = w_bytes_total                      # single-buffered resident weight
    else:
        tk = min(_round_up(min(k_tile, I_pad), 128), I_pad)
        while I_pad % tk:
            tk -= 128
        w_buf_bytes = 2 * tk * H_pad * w_elem_bytes      # double-buffered weight K-tiles

    if row_tile is None:
        row_tile = _pick_row_tile(rows)

    def vmem_buffers(rt):
        b = 2 * rt * tk * act_bytes          # hidden_states tiles (double-buffered)
        b += 2 * rt * H_pad * res_bytes      # residual tiles
        b += 2 * rt * H_pad * out_bytes      # output tiles
        b += w_buf_bytes                     # weight
        b += 4 * H_pad * 4                   # fused bias/gamma/beta/mask
        if not resident_ok:
            b += rt * H_pad * 4              # f32 accumulator scratch
        return b

    while row_tile > 16 and vmem_buffers(row_tile) > vmem_limit * 4 // 5:
        row_tile //= 2

    rows_pad = _round_up(rows, row_tile)

    # Activation streams stay in their input dtype; padding only when actually needed.
    h2d = _maybe_pad2d(hidden_states.reshape(rows, I), rows_pad, I_pad)
    r2d = _maybe_pad2d(input_tensor.reshape(rows, H), rows_pad, H_pad)

    # Parameters (small, one-time host prep): bf16 weight for the MXU and a fused f32 (4, H_pad)
    # constant block [bias, gamma, beta, validity-mask].
    w = weight
    if w.shape != (I_pad, H_pad):
        w = jnp.pad(w, ((0, I_pad - I), (0, H_pad - H)))
    w = w.astype(matmul_dtype)
    params = jnp.stack([
        jnp.pad(bias.astype(jnp.float32), (0, H_pad - H)),
        jnp.pad(gamma.astype(jnp.float32), (0, H_pad - H)),
        jnp.pad(beta.astype(jnp.float32), (0, H_pad - H)),
        (jnp.arange(H_pad) < H).astype(jnp.float32),
    ])

    w_reads = 1 if resident_ok else (rows_pad // row_tile)
    cost = pl.CostEstimate(
        flops=2 * rows_pad * I_pad * H_pad,
        transcendentals=0,
        bytes_accessed=(rows_pad * I_pad * act_bytes + rows_pad * H_pad * res_bytes +
                        rows_pad * H_pad * out_bytes + w_reads * w_bytes_total + 4 * H_pad * 4),
    )

    if resident_ok:
        grid = (rows_pad // row_tile,)
        out2d = pl.pallas_call(
            _make_resident_kernel(H, H_pad, eps, matmul_dtype),
            out_shape=jax.ShapeDtypeStruct((rows_pad, H_pad), out_dtype),
            grid_spec=pltpu.PrefetchScalarGridSpec(
                num_scalar_prefetch=0,
                grid=grid,
                in_specs=[
                    pl.BlockSpec((row_tile, I_pad), lambda i: (i, 0)),          # activations
                    pl.BlockSpec((I_pad, H_pad), lambda i: (0, 0),
                                 pipeline_mode=pl.Buffered(1)),                 # resident weight
                    pl.BlockSpec((4, H_pad), lambda i: (0, 0),
                                 pipeline_mode=pl.Buffered(1)),                 # bias/gamma/beta/mask
                    pl.BlockSpec((row_tile, H_pad), lambda i: (i, 0)),          # residual
                ],
                out_specs=pl.BlockSpec((row_tile, H_pad), lambda i: (i, 0)),
            ),
            compiler_params=pltpu.CompilerParams(
                dimension_semantics=("parallel",),
                vmem_limit_bytes=vmem_limit,
            ),
            cost_estimate=cost,
        )(h2d, w, params, r2d)
    else:
        grid = (rows_pad // row_tile, I_pad // tk)
        out2d = pl.pallas_call(
            _make_ktiled_kernel(H, H_pad, eps, matmul_dtype),
            out_shape=jax.ShapeDtypeStruct((rows_pad, H_pad), out_dtype),
            grid_spec=pltpu.PrefetchScalarGridSpec(
                num_scalar_prefetch=0,
                grid=grid,
                in_specs=[
                    pl.BlockSpec((row_tile, tk), lambda i, k: (i, k)),          # activation K-tile
                    pl.BlockSpec((tk, H_pad), lambda i, k: (k, 0)),             # weight K-tile
                    pl.BlockSpec((4, H_pad), lambda i, k: (0, 0),
                                 pipeline_mode=pl.Buffered(1)),                 # bias/gamma/beta/mask
                    pl.BlockSpec((row_tile, H_pad), lambda i, k: (i, 0)),       # residual
                ],
                out_specs=pl.BlockSpec((row_tile, H_pad), lambda i, k: (i, 0)),
                scratch_shapes=[pltpu.VMEM((row_tile, H_pad), jnp.float32)],
            ),
            compiler_params=pltpu.CompilerParams(
                dimension_semantics=("parallel", "arbitrary"),
                vmem_limit_bytes=vmem_limit,
            ),
            cost_estimate=cost,
        )(h2d, w, params, r2d)

    if rows_pad != rows or H_pad != H:
        out2d = out2d[:rows, :H]
    return out2d.reshape(B, S, H)


def reference(hidden_states, input_tensor, weight, bias, gamma, beta, *,
              matmul_cast=None, eps=LAYER_NORM_EPS):
    if matmul_cast is not None:  # mimic the kernel's bf16 MXU operands (f32 accumulate, f32 residual)
        hidden_states = hidden_states.astype(matmul_cast).astype(jnp.float32)
        weight = weight.astype(matmul_cast).astype(jnp.float32)
    x = jnp.einsum("bsi,ih->bsh", hidden_states, weight) + bias
    x = x + input_tensor
    mean = jnp.mean(x, axis=-1, keepdims=True)
    var = jnp.mean((x - mean) ** 2, axis=-1, keepdims=True)
    y = (x - mean) * jax.lax.rsqrt(var + eps)
    return y * gamma + beta


if __name__ == "__main__":
    key = jax.random.PRNGKey(0)
    k1, k2, k3, k4, k5, k6, k7, k8 = jax.random.split(key, 8)

    # ---- Test 1: resident-weight path, non-128 H (exercises the masked LayerNorm + padding) ----
    # BertOutput-consistent small config: intermediate_size=128, hidden_size=32.
    B, S, I, H = 2, 16, 128, 32
    hidden_states = jax.random.normal(k1, (B, S, I), dtype=jnp.float32)
    input_tensor = jax.random.normal(k2, (B, S, H), dtype=jnp.float32)
    # PyTorch Linear weight is [H, I]; stored transposed as [I, H] so the kernel does x @ W.
    weight = jax.random.normal(k3, (I, H), dtype=jnp.float32) * (1.0 / jnp.sqrt(I))
    bias = jax.random.normal(k4, (H,), dtype=jnp.float32) * 0.02
    gamma = jnp.ones((H,), dtype=jnp.float32)
    beta = jnp.zeros((H,), dtype=jnp.float32)

    out = jax.block_until_ready(
        bert_output(hidden_states, input_tensor, weight, bias, gamma, beta))
    ref_bf16 = reference(hidden_states, input_tensor, weight, bias, gamma, beta,
                         matmul_cast=jnp.bfloat16)
    ref_f32 = reference(hidden_states, input_tensor, weight, bias, gamma, beta)
    assert out.shape == (B, S, H)
    assert jnp.allclose(out, ref_bf16, atol=2e-3, rtol=2e-3), "mismatch vs bf16-operand reference"
    assert jnp.allclose(out, ref_f32, atol=5e-2, rtol=5e-2), "mismatch vs f32 reference"

    # ---- Test 2: force the K-tiled (reduction-grid) path used when the weight can't stay resident ----
    B2, S2, I2, H2 = 2, 32, 256, 128
    hs2 = jax.random.normal(k5, (B2, S2, I2), dtype=jnp.float32)
    it2 = jax.random.normal(k6, (B2, S2, H2), dtype=jnp.float32)
    w2 = jax.random.normal(k7, (I2, H2), dtype=jnp.float32) * (1.0 / jnp.sqrt(I2))
    b2 = jax.random.normal(k8, (H2,), dtype=jnp.float32) * 0.02
    g2 = jnp.ones((H2,), dtype=jnp.float32) * 1.1
    bt2 = jnp.full((H2,), 0.05, dtype=jnp.float32)

    out2 = jax.block_until_ready(
        bert_output(hs2, it2, w2, b2, g2, bt2, max_resident_weight_bytes=0, k_tile=128))
    ref2 = reference(hs2, it2, w2, b2, g2, bt2, matmul_cast=jnp.bfloat16)
    assert out2.shape == (B2, S2, H2)
    assert jnp.allclose(out2, ref2, atol=2e-3, rtol=2e-3), "K-tiled path mismatch"

    print("KERNEL_OK")
</pallas_src>

<mosaic_0001>
module attributes {stable_mosaic.version = 11 : i64} {
  func.func @kernel(%arg0: i32, %arg1: memref<16x128xf32, #tpu.memory_space<vmem>>, %arg2: memref<128x128xbf16, #tpu.memory_space<vmem>>, %arg3: memref<4x128xf32, #tpu.memory_space<vmem>>, %arg4: memref<16x128xf32, #tpu.memory_space<vmem>>, %arg5: memref<16x128xf32, #tpu.memory_space<vmem>>) attributes {dimension_semantics = [#tpu.dimension_semantics<parallel>], iteration_bounds = array<i64: 2>, scalar_prefetch = 0 : i64, scratch_operands = 0 : i64, tpu.core_type = #tpu.core_type<tc>, window_params = [{transform_indices = @transform_0, window_bounds = array<i64: 16, 128>}, {pipeline_mode = #tpu.pipeline_mode<synchronous>, transform_indices = @transform_1, window_bounds = array<i64: 128, 128>}, {pipeline_mode = #tpu.pipeline_mode<synchronous>, transform_indices = @transform_2, window_bounds = array<i64: 4, 128>}, {transform_indices = @transform_3, window_bounds = array<i64: 16, 128>}, {transform_indices = @transform_4, window_bounds = array<i64: 16, 128>}]} {
    %c0 = arith.constant 0 : index
    %c0_0 = arith.constant 0 : index
    %0 = vector.load %arg1[%c0, %c0_0] : memref<16x128xf32, #tpu.memory_space<vmem>>, vector<16x128xf32>
    %1 = arith.truncf %0 : vector<16x128xf32> to vector<16x128xbf16>
    %c0_1 = arith.constant 0 : index
    %c0_2 = arith.constant 0 : index
    %2 = vector.load %arg2[%c0_1, %c0_2] : memref<128x128xbf16, #tpu.memory_space<vmem>>, vector<128x128xbf16>
    %cst = arith.constant dense<0.000000e+00> : vector<16x128xf32>
    %3 = tpu.matmul %1, %2, %cst {dimension_numbers = #tpu.dot_dimension_numbers<[1], [0], [0], [1], [0, 0, 1, 1], [], []>} : vector<16x128xbf16>, vector<128x128xbf16>, vector<16x128xf32> -> vector<16x128xf32>
    %c0_3 = arith.constant 0 : index
    %c0_4 = arith.constant 0 : index
    %4 = vector.load %arg3[%c0_3, %c0_4] : memref<4x128xf32, #tpu.memory_space<vmem>>, vector<1x128xf32>
    %5 = vector.broadcast %4 : vector<1x128xf32> to vector<16x128xf32>
    %6 = arith.addf %3, %5 : vector<16x128xf32>
    %c0_5 = arith.constant 0 : index
    %c0_6 = arith.constant 0 : index
    %7 = vector.load %arg4[%c0_5, %c0_6] : memref<16x128xf32, #tpu.memory_space<vmem>>, vector<16x128xf32>
    %8 = arith.addf %6, %7 : vector<16x128xf32>
    %c3 = arith.constant 3 : index
    %c0_7 = arith.constant 0 : index
    %9 = vector.load %arg3[%c3, %c0_7] : memref<4x128xf32, #tpu.memory_space<vmem>>, vector<1x128xf32>
    %10 = vector.broadcast %9 : vector<1x128xf32> to vector<16x128xf32>
    %11 = arith.mulf %8, %10 : vector<16x128xf32>
    %cst_8 = arith.constant dense<0.000000e+00> : vector<16xf32>
    %12 = vector.multi_reduction <add>, %11, %cst_8 [1] : vector<16x128xf32> to vector<16xf32>
    %13 = vector.shape_cast %12 : vector<16xf32> to vector<16x1xf32>
    %cst_9 = arith.constant 3.125000e-02 : f32
    %14 = vector.broadcast %cst_9 : f32 to vector<16x1xf32>
    %15 = arith.mulf %13, %14 : vector<16x1xf32>
    %16 = vector.broadcast %15 : vector<16x1xf32> to vector<16x128xf32>
    %17 = arith.subf %11, %16 : vector<16x128xf32>
    %18 = vector.broadcast %9 : vector<1x128xf32> to vector<16x128xf32>
    %19 = arith.mulf %17, %18 : vector<16x128xf32>
    %20 = arith.mulf %19, %19 : vector<16x128xf32>
    %cst_10 = arith.constant dense<0.000000e+00> : vector<16xf32>
    %21 = vector.multi_reduction <add>, %20, %cst_10 [1] : vector<16x128xf32> to vector<16xf32>
    %22 = vector.shape_cast %21 : vector<16xf32> to vector<16x1xf32>
    %cst_11 = arith.constant 3.125000e-02 : f32
    %23 = vector.broadcast %cst_11 : f32 to vector<16x1xf32>
    %24 = arith.mulf %22, %23 : vector<16x1xf32>
    %cst_12 = arith.constant 9.99999996E-13 : f32
    %25 = vector.broadcast %cst_12 : f32 to vector<16x1xf32>
    %26 = arith.addf %24, %25 : vector<16x1xf32>
    %27 = math.rsqrt %26 : vector<16x1xf32>
    %28 = vector.broadcast %27 : vector<16x1xf32> to vector<16x128xf32>
    %29 = arith.mulf %17, %28 : vector<16x128xf32>
    %c1 = arith.constant 1 : index
    %c0_13 = arith.constant 0 : index
    %30 = vector.load %arg3[%c1, %c0_13] : memref<4x128xf32, #tpu.memory_space<vmem>>, vector<1x128xf32>
    %31 = vector.broadcast %30 : vector<1x128xf32> to vector<16x128xf32>
    %32 = arith.mulf %29, %31 : vector<16x128xf32>
    %c2 = arith.constant 2 : index
    %c0_14 = arith.constant 0 : index
    %33 = vector.load %arg3[%c2, %c0_14] : memref<4x128xf32, #tpu.memory_space<vmem>>, vector<1x128xf32>
    %34 = vector.broadcast %33 : vector<1x128xf32> to vector<16x128xf32>
    %35 = arith.addf %32, %34 : vector<16x128xf32>
    %c0_15 = arith.constant 0 : index
    %c0_16 = arith.constant 0 : index
    %36 = vector.load %arg5[%c0_15, %c0_16] : memref<16x128xf32, #tpu.memory_space<vmem>>, vector<16x128xf32>
    tpu.vector_store %arg5[%c0_15, %c0_16], %35 {strides = array<i32>} : memref<16x128xf32, #tpu.memory_space<vmem>>, vector<16x128xf32>,
    return
  }
  func.func @transform_0(%arg0: i32) -> (i32, i32) {
    %c0_i32 = arith.constant 0 : i32
    %c0_i32_0 = arith.constant 0 : i32
    return %arg0, %c0_i32 : i32, i32
  }
  func.func @transform_1(%arg0: i32) -> (i32, i32) {
    %c0_i32 = arith.constant 0 : i32
    %c0_i32_0 = arith.constant 0 : i32
    %c0_i32_1 = arith.constant 0 : i32
    return %c0_i32, %c0_i32_0 : i32, i32
  }
  func.func @transform_2(%arg0: i32) -> (i32, i32) {
    %c0_i32 = arith.constant 0 : i32
    %c0_i32_0 = arith.constant 0 : i32
    %c0_i32_1 = arith.constant 0 : i32
    return %c0_i32, %c0_i32_0 : i32, i32
  }
  func.func @transform_3(%arg0: i32) -> (i32, i32) {
    %c0_i32 = arith.constant 0 : i32
    %c0_i32_0 = arith.constant 0 : i32
    return %arg0, %c0_i32 : i32, i32
  }
  func.func @transform_4(%arg0: i32) -> (i32, i32) {
    %c0_i32 = arith.constant 0 : i32
    %c0_i32_0 = arith.constant 0 : i32
    return %arg0, %c0_i32 : i32, i32
  }
}

</mosaic_0001>

<bundles_post_ra>
// kernel: tpu_custom_call.1
= control target key start
LH: loop header
LB: loop body
LE: loop exit
PB: predicated region body
PF: predicated region fallthrough
CT: control target
= control target key end

     0   :  { %9 = vsyncpa [#allocation3], 0  ;;  %s1184_s0 = inlined_call_operand.hbm [shape: f32[32,128], index: 0, kind: input, shape index: {}]   ;;  %s1185_s1 = inlined_call_operand.hbm [shape: bf16[128,128], index: 1, kind: input, shape index: {}]   ;;  %s1186_s2 = inlined_call_operand.vmem [shape: f32[4,128], index: 2, kind: input, shape index: {}]   ;;  %s1187_s3 = inlined_call_operand.hbm [shape: f32[32,128], index: 3, kind: input, shape index: {}]   ;;  %s1188_s4 = inlined_call_operand.hbm [shape: f32[32,128], index: 4, kind: output, shape index: {}]  }
   0x1   :  { %11 = vsyncpa [#allocation3 + $0x1], 0 }
   0x2   :  { %12 = vsyncpa [#allocation6], 0 }
   0x3   :  { %13 = vsyncpa [#allocation4], 0 }
   0x4   :  { %15 = vsyncpa [#allocation4 + $0x1], 0  ;;  %s900_s15 = smov 0   ;;  %s902_s16 = smov 0  }
   0x5   :  { %s904_s17 = smov 0   ;;  %s906_s18 = smov 0  }
   0x6 LB: > { %s921_s19 = sadd.s32 1, %s861_s18   ;;  %s28_s20 = sadd.s32 1, %s857_s17  ;;  %s861_s18 = sphi %s906_s18, %s1211_s18   ;;  %s857_s17 = sphi %s904_s17, %s1210_s17   ;;  %s853_s16 = sphi %s902_s16, %s1209_s16   ;;  %s849_s15 = sphi %s900_s15, %s1208_s15  }
   0x7   : > { %s25_s21 = ssub.s32 %s861_s18, %s921_s19  ;;  %p35_p0 = scmp.ne.s32.totalorder %s857_s17, %s853_s16 }
   0x8   : > { %p26_p1 = scmp.eq.s32.totalorder %s25_s21, 0  ;;  %p36_p2 = scmp.eq.s32.totalorder %s861_s18, 0 }
   0x9   : > { %p643_p4 = scmp.lt.s32.totalorder %s861_s18, 2  ;;  %s175_s23 = sand.u32 1, %s861_s18  }
   0xa   : > { %s932_s22 = scalar_select %p26_p1, %s857_s17, %s28_s20  }
   0xb   : > { %p37_p5 = por %p36_p2, %p35_p0  ;;  %s177_s24 = sand.u32 1, %s857_s17  }
   0xc   : > { %s939_s25 = sshll.u32 %s177_s24, 4  ;;  %s585_s26 = sshll.u32 %s861_s18, 8 }
   0xd   : > { %s947_s29 = scalar_lea.hbm %s1184_s0, %s585_s26  ;;  %s179_s30 = scalar_lea.vmem [#allocation2], %s939_s25 }
   0xe   : > { %s186_s5 = sshll.u32 %s179_s30, 4  ;;  %p950_p6 = pnand %p643_p4, %p37_p5  ;;  %s954_s5 = int_to_ptr.vmem [resolvable:$true] %s186_s5 }
   0xf   : > { %s956_s7 = scalar_lea.sflag [#allocation3], %s175_s23  ;;  %s699_s8 = scalar_lea.hbm %s947_s29, 256 }
  0x10   : > { %p700_p7 = scmp.ne.s32.totalorder %s947_s29, %s699_s8  ;;  %p701_p8 = pneg %p950_p6 }
  0x11   : > { %s704_s11 = scalar_lea.hbm %s1184_s0, 512  ;;  %p705_p11 = scmp.lt.u32.totalorder %s947_s29, %s1184_s0 }
  0x12   : > { %p702_p9 = pnand %p701_p8, %p700_p7  ;;  %p706_p12 = scmp.lt.u32.totalorder %s704_s11, %s699_s8 }
  0x13   : > { %p708_p1 = scmp.lt.u32.totalorder %s699_s8, %s947_s29 }
  0x14   : > { %p703_p10 = pneg %p702_p9  ;;  %p707_p13 = por %p706_p12, %p705_p11 }
  0x16   : > { %p709_p2 = por %p708_p1, %p707_p13 }
  0x18   : > { %p710_p4 = pnand %p709_p2, %p703_p10 }
  0x1a   : > { %713 = shalt.err (!%p710_p4)
}
  0x1b   : > { %s714_s14 = scalar_lea.vmem %s954_s5, 256  ;;  %s863_s20 = smov [#allocation2]  }
  0x1c   : > { %p715_p5 = scmp.ne.s32.totalorder %s954_s5, %s714_s14  ;;  %s719_s21 = sshll.u32 %s863_s20, 4  ;;  %s720_s21 = int_to_ptr.vmem [resolvable:$false] %s719_s21 }
  0x1d   : > { %s721_s23 = scalar_lea.vmem %s720_s21, 512  ;;  %p722_p3 = scmp.lt.s32.totalorder %s954_s5, %s720_s21 }
  0x1e   : > { %p717_p7 = pnand %p715_p5, %p701_p8  ;;  %p723_p11 = scmp.lt.s32.totalorder %s721_s23, %s714_s14 }
  0x20   : > { %p718_p9 = pneg %p717_p7  ;;  %p724_p12 = por %p723_p11, %p722_p3 }
  0x22   : > { %p725_p13 = pnand %p724_p12, %p718_p9 }
  0x24   : > { %728 = shalt.err (!%p725_p13)
}
  0x25   : > { %s864_s24 = smov 128   ;;  %s865_s27 = smov 8  }
  0x26   : > { %634 = dma.hbm_to_vmem [thread:$0]  (!%p950_p6), %s947_s29, 256, %s954_s5, %s956_s7, %s864_s24, %s864_s24, %s865_s27  }
  0x27   : > { %s992_s8 = scalar_lea.hbm %s1187_s3, %s585_s26  ;;  %s200_s9 = scalar_lea.vmem [#allocation7], %s939_s25 }
  0x28   : > { %s207_s10 = sshll.u32 %s200_s9, 4  ;;  %s996_s11 = sadd.s32 4294967295, %s861_s18   ;;  %s1022_s10 = int_to_ptr.vmem [resolvable:$true] %s207_s10 }
  0x29   : > { %s553_s12 = sadd.s32 4294967294, %s861_s18   ;;  %p41_p3 = scmp.ne.s32.totalorder %s853_s16, %s849_s15 }
  0x2a   : > { %p1189_p10 = scmp.eq.s32.totalorder %s996_s11, 0  ;;  %p133_p1 = scmp.eq.s32.totalorder %s996_s11, 1 }
  0x2b   : > { %p139_p2 = scmp.eq.s32.totalorder %s553_s12, 1  ;;  %p554_p5 = scmp.ge.s32.totalorder %s861_s18, 1 }
  0x2c   : > { %p1005_p4 = por %p1189_p10, %p41_p3  ;;  %p1013_p7 = por %p133_p1, %p35_p0 }
  0x2d   : > { %p1017_p9 = por %p139_p2, %p41_p3  ;;  %p146_p11 = scmp.lt.s32.totalorder %s861_s18, 3 }
  0x2e   : > { %s1194_s29 = scalar_select %p1005_p4, 1, 0 }
  0x2f   : > { %s1195_s25 = scalar_select %p1013_p7, 1, 0 }
  0x30   : > { %s1196_s26 = scalar_select %p1017_p9, 1, 0 }
  0x31   : > { %p1024_p12 = pnand %p554_p5, %p146_p11  ;;  %s866_s13 = smov [#allocation5]  }
  0x32   : > { %s158_s14 = sshll.u32 %s866_s13, 4  ;;  %s729_s20 = scalar_lea.hbm %s992_s8, 256  ;;  %s1030_s14 = int_to_ptr.vmem [resolvable:$true] %s158_s14 }
  0x33   : > { %s1197_s5 = scalar_select %p1024_p12, 1, 0 }
  0x34   : > { %p730_p13 = scmp.ne.s32.totalorder %s992_s8, %s729_s20  ;;  %s734_s28 = scalar_lea.hbm %s1187_s3, 512 }
  0x35   : > { %p735_p2 = scmp.lt.u32.totalorder %s992_s8, %s1187_s3  ;;  %p736_p5 = scmp.lt.u32.totalorder %s734_s28, %s729_s20 }
  0x36   : > { %p732_p3 = pnand %p730_p13, %p701_p8  ;;  %p738_p10 = scmp.lt.u32.totalorder %s729_s20, %s992_s8 }
  0x37   : > { %p737_p11 = por %p736_p5, %p735_p2 }
  0x38   : > { %p733_p1 = pneg %p732_p3 }
  0x39   : > { %p739_p0 = por %p738_p10, %p737_p11 }
  0x3b   : > { %p740_p9 = pnand %p739_p0, %p733_p1 }
  0x3d   : > { %743 = shalt.err (!%p740_p9)
}
  0x3e   : > { %s744_s12 = scalar_lea.vmem %s1022_s10, 256  ;;  %s867_s13 = smov [#allocation7]  }
  0x3f   : > { %p745_p13 = scmp.ne.s32.totalorder %s1022_s10, %s744_s12  ;;  %s749_s21 = sshll.u32 %s867_s13, 4  ;;  %s750_s21 = int_to_ptr.vmem [resolvable:$false] %s749_s21 }
  0x40   : > { %s751_s23 = scalar_lea.vmem %s750_s21, 512  ;;  %p752_p4 = scmp.lt.s32.totalorder %s1022_s10, %s750_s21 }
  0x41   : > { %p747_p3 = pnand %p745_p13, %p701_p8  ;;  %p753_p2 = scmp.lt.s32.totalorder %s751_s23, %s744_s12 }
  0x43   : > { %p748_p7 = pneg %p747_p3  ;;  %p754_p5 = por %p753_p2, %p752_p4 }
  0x45   : > { %p755_p10 = pnand %p754_p5, %p748_p7 }
  0x47   : > { %758 = shalt.err (!%p755_p10)
}
  0x48   : > { %637 = dma.hbm_to_vmem [thread:$0]  (!%p950_p6), %s992_s8, 256, %s1022_s10, %s956_s7, %s864_s24, %s864_s24, %s865_s27  }
  0x49   : > { %p1198_p8 = scmp.eq.s32.totalorder %s996_s11, 0  ;;  %p1199_p9 = pneg %p1024_p12 }
  0x4a   : > { %s759_s6 = scalar_lea.hbm %s1185_s1, 1024 }
  0x4b   : > { %p1064_p0 = pnand %p1199_p9, %p1198_p8  ;;  %p760_p4 = scmp.ne.s32.totalorder %s1185_s1, %s759_s6 }
  0x4c   : > { %p766_p11 = scmp.lt.u32.totalorder %s759_s6, %s1185_s1 }
  0x4d   : > { %p761_p7 = pneg %p1064_p0 }
  0x4f   : > { %p762_p1 = pnand %p761_p7, %p760_p4 }
  0x51   : > { %p763_p6 = pneg %p762_p1 }
  0x53   : > { %p768_p13 = pnand %p766_p11, %p763_p6 }
  0x55   : > { %771 = shalt.err (!%p768_p13)
}
  0x56   : > { %s772_s27 = scalar_lea.vmem %s1030_s14, 1024  ;;  %p780_p10 = scmp.lt.s32.totalorder %s1030_s14, %s1030_s14 }
  0x57   : > { %p773_p3 = scmp.ne.s32.totalorder %s1030_s14, %s772_s27  ;;  %p781_p8 = scmp.lt.s32.totalorder %s772_s27, %s772_s27 }
  0x59   : > { %p775_p2 = pnand %p773_p3, %p761_p7  ;;  %p782_p9 = por %p781_p8, %p780_p10 }
  0x5b   : > { %p776_p5 = pneg %p775_p2 }
  0x5d   : > { %p783_p12 = pnand %p782_p9, %p776_p5 }
  0x5f   : > { %786 = shalt.err (!%p783_p12)
}
  0x60   : > { %s868_s8 = smov 64   ;;  %s869_s10 = smov 4  }
  0x61   : > { %630 = dma.hbm_to_vmem [thread:$0]  (!%p1064_p0), %s1185_s1, 1024, %s1030_s14, [#allocation6], %s868_s8, %s868_s8, %s869_s10  }
  0x62   : > { %p1201_p4 = scmp.ne.s32.totalorder %s1197_s5, 0 }
  0x63   : > { %s221_s23 = sand.u32 (!%p1201_p4), 1, %s996_s11   ;;  %s223_s28 = sand.u32 (!%p1201_p4), 1, %s853_s16  }
  0x64   : > { %219 = sbr.rel (%p1201_p4) target bundleno = 697 (0x2b9), region = 36  ;;  %s1095_s30 = sshll.u32 (!%p1201_p4), %s223_s28, 4 }
  0x65   : > { %s222_s6 = scalar_lea.sflag (!%p1201_p4), [#allocation3], %s221_s23  ;;  %s225_s9 = scalar_lea.vmem (!%p1201_p4), [#allocation2], %s1095_s30 }
  0x66   : > { %p1202_p12 = scmp.ne.s32.totalorder (!%p1201_p4), %s1194_s29, 0 }
  0x6b   : > { %832 = dma.done.wait (%p1202_p12), %s222_s6, 256  }
  0x6c   : > { %834 = vsyncadd (%p1202_p12), %s222_s6, 4294967040  ;;  %p1203_p0 = scmp.eq.s32.totalorder %s996_s11, 0 }
  0x6e   : > { %836 = dma.done.wait (%p1203_p0), [#allocation6], 1024   ;;  %p1204_p7 = pmov %p1203_p0 }
  0x6f   : > { %s238_s5 = scalar_lea.vmem [#allocation7], %s1095_s30 }
  0x70   : > { %838 = vsyncadd (%p1204_p7), [#allocation6], 4294966272 }
  0x71   : > { %840 = dma.done.wait (%p1202_p12), %s222_s6, 256  }
  0x72   : > { %842 = vsyncadd (%p1202_p12), %s222_s6, 4294967040  ;;  %v870_v0 = vmov 0.0   ;;  %vm871_vm0 = vmmov 0   ;;  %v687_v1 = vld [vmem:[#allocation5] sm:$0xff]   ;;  %v688_v2 = vld [vmem:[#allocation5 + $0x8] sm:$0xff]   ;;  %s587_s10 = sshll.u32 %s996_s11, 8 }
  0x73   : > { %597 = vmatprep.subr.bf16.mxu0 %v870_v0  ;;  %613 = vmatprep.mubr.msk.bf16.mxu0 %vm871_vm0, %v870_v0  ;;  %v689_v3 = vld [vmem:[#allocation5 + $0x10] sm:$0xff]   ;;  %v690_v4 = vld [vmem:[#allocation5 + $0x18] sm:$0xff]   ;;  %v691_v5 = vld [vmem:[#allocation5 + $0x20] sm:$0xff]   ;;  %s267_s13 = scalar_lea.vmem [#allocation8], %s1095_s30  ;;  %p1205_p6 = scmp.ne.s32.totalorder %s1195_s25, 0 }
  0x74   : > { %598 = vmatpush3.bf16.msra.mxu0 %v687_v1  ;;  %v692_v6 = vld [vmem:[#allocation5 + $0x28] sm:$0xff]   ;;  %v693_v7 = vld [vmem:[#allocation5 + $0x30] sm:$0xff]   ;;  %v694_v8 = vld [vmem:[#allocation5 + $0x38] sm:$0xff]   ;;  %s450_s21 = sshll.u32 %s267_s13, 4  ;;  %s872_s30 = smov [#allocation8]   ;;  %s1138_s21 = int_to_ptr.vmem [resolvable:$true] %s450_s21 }
  0x75   : > { %599 = vmatprep.subr.bf16.mxu0 %v870_v0  ;;  %v272_v9 = vld [vmem:[%s225_s9] sm:$0xff]  ;;  %v273_v10 = vld [vmem:[%s225_s9 + $0x8] sm:$0xff]  ;;  %s1136_s9 = scalar_lea.hbm %s1188_s4, %s587_s10  ;;  %s787_s11 = scalar_lea.vmem %s1138_s21, 256 }
  0x76   : > { %v274_v11 = vpack.c.bf16 %v273_v10, %v272_v9  ;;  %v568_v12 = vld [vmem:[%s1186_s2] ss:$0 sm:$0xff]  ;;  %v386_v18 = vld [vmem:[%s238_s5 + $0x8] sm:$0xff]  ;;  %v577_v19 = vld [vmem:[%s1186_s2 + $0x3] ss:$0 sm:$0xff]  ;;  %p788_p1 = scmp.ne.s32.totalorder %s1138_s21, %s787_s11  ;;  %s791_s29 = sshll.u32 %s872_s30, 4  ;;  %s792_s29 = int_to_ptr.vmem [resolvable:$false] %s791_s29 }
  0x77   : > { %v385_v14 = vld [vmem:[%s238_s5] sm:$0xff]  ;;  %s1142_s5 = scalar_lea.sflag [#allocation4], %s223_s28  ;;  %s793_s14 = scalar_lea.vmem %s792_s29, 512 }
  0x78   : > { %600 = vmatpush3.bf16.msra.mxu0 %v688_v2  ;;  %v578_v43 = vld [vmem:[%s1186_s2 + $0x1] ss:$0 sm:$0xff]  ;;  %v579_v45 = vld [vmem:[%s1186_s2 + $0x2] ss:$0 sm:$0xff]  ;;  %p789_p11 = pnand %p788_p1, %p1205_p6  ;;  %p794_p3 = scmp.lt.s32.totalorder %s1138_s21, %s792_s29 }
  0x79   : > { %601 = vmatprep.subr.bf16.mxu0 %v870_v0  ;;  %p795_p2 = scmp.lt.s32.totalorder %s793_s14, %s787_s11 }
  0x7a   : > { %p790_p13 = pneg %p789_p11 }
  0x7b   : > { %p796_p5 = por %p795_p2, %p794_p3 }
  0x7c   : > { %602 = vmatpush3.bf16.msra.mxu0 %v689_v3 }
  0x7d   : > { %603 = vmatprep.subr.bf16.mxu0 %v870_v0  ;;  %p797_p10 = pnand %p796_p5, %p790_p13 }
  0x80   : > { %604 = vmatpush3.bf16.msra.mxu0 %v690_v4 }
  0x81   : > { %605 = vmatprep.subr.bf16.mxu0 %v870_v0 }
  0x84   : > { %606 = vmatpush3.bf16.msra.mxu0 %v691_v5 }
  0x85   : > { %607 = vmatprep.subr.bf16.mxu0 %v870_v0 }
  0x88   : > { %608 = vmatpush3.bf16.msra.mxu0 %v692_v6 }
  0x89   : > { %609 = vmatprep.subr.bf16.mxu0 %v870_v0 }
  0x8c   : > { %610 = vmatpush3.bf16.msra.mxu0 %v693_v7 }
  0x8d   : > { %611 = vmatprep.subr.bf16.mxu0 %v870_v0 }
  0x90   : > { %612 = vmatpush3.bf16.msra.mxu0 %v694_v8 }
  0x93   : > { %614 = vmatmul.mubr.bf16.vlgmr.msra.gmra.mrb[0].mxu0 %v274_v11 }
 0x166   : > { %v378_v13 = vpop.f32.mrb[0].mxu0 }
 0x167   : > { %v379_v15 = vadd.f32 %v568_v12, %v378_v13  ;;  %v615_v16 = vpop.f32.mrb[1].mxu0 }
 0x168   : > { %v381_v17 = vpop.f32.mrb[2].mxu0 }
 0x169   : > { %v387_v20 = vadd.f32 %v385_v14, %v379_v15  ;;  %v382_v21 = vadd.f32 %v568_v12, %v381_v17  ;;  %v616_v22 = vpop.f32.mrb[3].mxu0 }
 0x16b   : > { %v388_v23 = vadd.f32 %v386_v18, %v382_v21  ;;  %v394_v24 = vmul.f32 %v577_v19, %v387_v20 }
 0x16d   : > { %396 = vadd.xlane.f32.xlu0 %v394_v24  ;;  %v395_v25 = vmul.f32 %v577_v19, %v388_v23 }
 0x171   : > { %398 = vadd.xlane.f32.xlu0 %v395_v25 }
 0x1fa   : > { %v397_v26 = vpop.xlane.xlu0 %396 }
 0x1fb   : > { %v400_v27 = vmul.f32 0.03125, %v397_v26 }
 0x1fd   : > { %v402_v28 = vsub.f32 %v394_v24, %v400_v27 }
 0x1fe   : > { %v399_v29 = vpop.xlane.xlu0 %398 }
 0x1ff   : > { %v401_v30 = vmul.f32 0.03125, %v399_v29  ;;  %v404_v31 = vmul.f32 %v577_v19, %v402_v28 }
 0x201   : > { %v403_v32 = vsub.f32 %v395_v25, %v401_v30  ;;  %v406_v33 = vmul.f32 %v404_v31, %v404_v31 }
 0x203   : > { %408 = vadd.xlane.f32.xlu1 %v406_v33  ;;  %v405_v34 = vmul.f32 %v577_v19, %v403_v32 }
 0x205   : > { %v407_v35 = vmul.f32 %v405_v34, %v405_v34 }
 0x207   : > { %410 = vadd.xlane.f32.xlu1 %v407_v35 }
 0x290   : > { %v409_v36 = vpop.xlane.xlu1 %408 }
 0x291   : > { %v412_v37 = vmul.f32 0.03125, %v409_v36 }
 0x293   : > { %v414_v38 = vadd.f32 1e-12, %v412_v37 }
 0x294   : > { %v411_v39 = vpop.xlane.xlu1 %410 }
 0x295   : > { %695 = vrsqrt.f32 %v414_v38  ;;  %v413_v40 = vmul.f32 0.03125, %v411_v39 }
 0x297   : > { %v415_v41 = vadd.f32 1e-12, %v413_v40 }
 0x299   : > { %697 = vrsqrt.f32 %v415_v41 }
 0x29f   : > { %v696_v42 = vpop.eup %695 }
 0x2a0   : > { %v418_v44 = vmul.f32 %v696_v42, %v402_v28 }
 0x2a2   : > { %v425_v46 = vmul.f32 %v578_v43, %v418_v44 }
 0x2a3   : > { %v698_v47 = vpop.eup %697 }
 0x2a4   : > { %v432_v48 = vadd.f32 %v579_v45, %v425_v46  ;;  %v419_v49 = vmul.f32 %v698_v47, %v403_v32 }
 0x2a6   : > { %v426_v50 = vmul.f32 %v578_v43, %v419_v49  ;;  %434 = vst [vmem:[%s267_s13] sm:$0xff] %v432_v48 }
 0x2a8   : > { %v433_v51 = vadd.f32 %v579_v45, %v426_v50 }
 0x2aa   : > { %435 = vst [vmem:[%s267_s13 + $0x8] sm:$0xff] %v433_v51 }
 0x2ab   : > { %800 = shalt.err (!%p797_p10)
}
 0x2ac   : > { %s801_s28 = scalar_lea.hbm %s1136_s9, 256  ;;  %s805_s7 = scalar_lea.hbm %s1188_s4, 512 }
 0x2ad   : > { %p802_p8 = scmp.ne.s32.totalorder %s1136_s9, %s801_s28  ;;  %p806_p12 = scmp.lt.u32.totalorder %s1136_s9, %s1188_s4 }
 0x2ae   : > { %p807_p0 = scmp.lt.u32.totalorder %s805_s7, %s801_s28  ;;  %p809_p1 = scmp.lt.u32.totalorder %s801_s28, %s1136_s9 }
 0x2af   : > { %p803_p9 = pnand %p802_p8, %p1205_p6 }
 0x2b0   : > { %p808_p7 = por %p807_p0, %p806_p12 }
 0x2b1   : > { %p804_p4 = pneg %p803_p9 }
 0x2b2   : > { %p810_p11 = por %p809_p1, %p808_p7 }
 0x2b4   : > { %p811_p13 = pnand %p810_p11, %p804_p4 }
 0x2b6   : > { %814 = shalt.err (!%p811_p13)
}
 0x2b7   : > { %s873_s8 = smov 128   ;;  %s874_s10 = smov 8  }
 0x2b8   : > { %625 = dma.vmem_to_hbm [thread:$0]  (%p1205_p6), %s1138_s21, 256, %s1136_s9, %s1142_s5, %s873_s8, %s873_s8, %s874_s10  }
 0x2b9 PF: > { %s465_s13 = sand.u32 1, %s849_s15   ;;  %p1206_p3 = scmp.ne.s32.totalorder %s1196_s26, 0 }
 0x2ba   : > { %p1207_p2 = scmp.ge.s32.totalorder %s861_s18, 2  ;;  %s466_s23 = scalar_lea.sflag [#allocation4], %s465_s13 }
 0x2bc   : > { %p639_p5 = pnand %p1207_p2, %p1206_p3 }
 0x2be   : > { %844 = dma.done.wait (!%p639_p5), %s466_s23, 256  }
 0x2bf   : > { %846 = vsyncadd (!%p639_p5), %s466_s23, 4294967040  ;;  %p18_p10 = scmp.ge.s32.totalorder %s921_s19, 4   ;;  %s1208_s15 = smov %s853_s16 }
 0x2c0   : > { %s1209_s16 = smov %s857_s17  ;;  %s1210_s17 = smov %s932_s22 }
 0x2c1   : > { %s1211_s18 = smov %s921_s19  ;;  %20 = sbr.rel (!%p18_p10) target bundleno = 6 (0x6), region = 96 }
 0x2c8   :  { %471 = vsyncpa [#allocation3], 1 }
 0x2c9   :  { %473 = vsyncpa [#allocation3 + $0x1], 1 }
 0x2ca   :  { %474 = vsyncpa [#allocation6], 1 }
 0x2cb   :  { %475 = vsyncpa [#allocation4], 1 }
 0x2cc   :  { %477 = vsyncpa [#allocation4 + $0x1], 1 }

</bundles_post_ra>
